<compile_context>
chip_gen: v5e
topology: v5e:2x2
jax: 0.10.0
libtpu: 0.0.40
codegen_flags: <defaults>
</compile_context>

<pallas_src>
import math

import jax
import jax.numpy as jnp
from jax.experimental import pallas as pl
from jax.experimental.pallas import tpu as pltpu


_LANE_CANDIDATES = (1024, 512, 256, 128)
_NUM_CORE_SPLITS = 2      # leading "parallel" grid axis (v7x: 2 TensorCores/chip)
_SUBLANE = 8


def _choose_lanes(n):
    """Widest lane count (multiple of 128) dividing n; else pad to 128 (tiny pad)."""
    for cand in _LANE_CANDIDATES:
        if n % cand == 0:
            return cand, 0
    return 128, (-n) % 128


def _as_rows(x, lanes, pad):
    """Flatten to a contiguous (rows, lanes) view; (p=1,y=1) pad => zero loss."""
    flat = x.reshape(-1)
    if pad:
        flat = jnp.pad(flat, (0, pad), constant_values=1)
    return flat.reshape(-1, lanes)


def _plan_stream(pred, label, target_block_bytes):
    """Static tiling plan for one (pred, label) stream."""
    n = int(math.prod(pred.shape))
    lanes, pad = _choose_lanes(n)
    n_rows = (n + pad) // lanes
    itemsize = max(jnp.dtype(pred.dtype).itemsize, jnp.dtype(label.dtype).itemsize)
    rows_budget = max(_SUBLANE,
                      (target_block_bytes // (lanes * itemsize)) // _SUBLANE * _SUBLANE)
    row_tile = n_rows if n_rows <= rows_budget else rows_budget
    n_tiles = -(-n_rows // row_tile)
    n_full_tiles = n_rows // row_tile
    return dict(pad=pad, lanes=lanes, n_rows=n_rows, row_tile=row_tile,
                n_tiles=n_tiles, n_full_tiles=n_full_tiles)


def _loglik_block(p, y, hard_labels):
    """y*log(p) + (1-y)*log(1-p), each log clamped at -100 (PyTorch BCELoss)."""
    if hard_labels:
        # Exact only for labels in {0,1}: one EUP log per element instead of two.
        q = jnp.where(y > 0.5, p, 1.0 - p)
        return jnp.maximum(jnp.log(q), -100.0)
    log_p = jnp.maximum(jnp.log(p), -100.0)
    log_1mp = jnp.maximum(jnp.log(1.0 - p), -100.0)
    # Rewritten form saves one mul + one sub per element (no f32 FMA on the VPU).
    return log_1mp + y * (log_p - log_1mp)


def _make_fused_kernel(streams, t_half, hard_labels):
    """Kernel accumulating sum(BCE) over both streams, one scalar partial per core."""

    def kernel(np_ref, nl_ref, rp_ref, rl_ref, out_ref, acc_ner, acc_re):
        c = pl.program_id(0)              # core-split index ("parallel")
        i = pl.program_id(1)              # row-tile index within this core's share
        g = c * t_half + i                # global row-tile index

        @pl.when(i == 0)
        def _():
            acc_ner[...] = jnp.zeros_like(acc_ner)
            acc_re[...] = jnp.zeros_like(acc_re)

        def accumulate(pred_ref, label_ref, acc_ref, st):
            n_rows, row_tile, lanes = st["n_rows"], st["row_tile"], st["lanes"]
            n_tiles, n_full = st["n_tiles"], st["n_full_tiles"]

            @pl.when(g < n_full)                      # fully-valid tiles: no mask math
            def _():
                p = pred_ref[...].astype(jnp.float32)
                y = label_ref[...].astype(jnp.float32)
                acc_ref[...] -= _loglik_block(p, y, hard_labels)

            if n_full != n_tiles:                     # static: stream has a partial tail
                @pl.when(g == n_tiles - 1)
                def _():
                    p = pred_ref[...].astype(jnp.float32)
                    y = label_ref[...].astype(jnp.float32)
                    row_ids = (n_tiles - 1) * row_tile + jax.lax.broadcasted_iota(
                        jnp.int32, (row_tile, lanes), 0)
                    valid = row_ids < n_rows
                    # Mask BEFORE the logs; (p=1, y=1) contributes exactly zero.
                    p = jnp.where(valid, p, 1.0)
                    y = jnp.where(valid, y, 1.0)
                    acc_ref[...] -= _loglik_block(p, y, hard_labels)

        accumulate(np_ref, nl_ref, acc_ner, streams[0])
        accumulate(rp_ref, rl_ref, acc_re, streams[1])

        @pl.when(i == pl.num_programs(1) - 1)
        def _():
            total = jnp.sum(acc_ner[...]) + jnp.sum(acc_re[...])
            out_ref[...] = jnp.full((_SUBLANE, 128), total, dtype=jnp.float32)

    return kernel


def bce_pair_sum(ner_pred, ner_label, re_pred, re_label, *,
                 hard_labels=False, target_block_bytes=2 * 1024 * 1024):
    """sum(BCE(ner_pred, ner_label)) + sum(BCE(re_pred, re_label)), one pallas_call."""
    assert ner_pred.shape == ner_label.shape, (ner_pred.shape, ner_label.shape)
    assert re_pred.shape == re_label.shape, (re_pred.shape, re_label.shape)

    st_ner = _plan_stream(ner_pred, ner_label, target_block_bytes)
    st_re = _plan_stream(re_pred, re_label, target_block_bytes)

    np2 = _as_rows(ner_pred, st_ner["lanes"], st_ner["pad"])
    nl2 = _as_rows(ner_label, st_ner["lanes"], st_ner["pad"])
    rp2 = _as_rows(re_pred, st_re["lanes"], st_re["pad"])
    rl2 = _as_rows(re_label, st_re["lanes"], st_re["pad"])

    t_max = max(st_ner["n_tiles"], st_re["n_tiles"])
    t_half = -(-t_max // _NUM_CORE_SPLITS)
    grid = (_NUM_CORE_SPLITS, t_half)

    def in_map(n_tiles):
        last = n_tiles - 1

        def im(c, i):
            g = c * t_half + i
            # Clamp once a stream is exhausted: same block index => no extra DMA.
            return (jnp.minimum(g, last), 0)

        return im

    kernel = _make_fused_kernel((st_ner, st_re), t_half, hard_labels)

    out = pl.pallas_call(
        kernel,
        out_shape=jax.ShapeDtypeStruct((_NUM_CORE_SPLITS * _SUBLANE, 128), jnp.float32),
        grid=grid,
        in_specs=[
            pl.BlockSpec((st_ner["row_tile"], st_ner["lanes"]), in_map(st_ner["n_tiles"])),
            pl.BlockSpec((st_ner["row_tile"], st_ner["lanes"]), in_map(st_ner["n_tiles"])),
            pl.BlockSpec((st_re["row_tile"], st_re["lanes"]), in_map(st_re["n_tiles"])),
            pl.BlockSpec((st_re["row_tile"], st_re["lanes"]), in_map(st_re["n_tiles"])),
        ],
        # Per-core disjoint (8,128) partial-output blocks (lane-dense, unmasked store).
        out_specs=pl.BlockSpec((_SUBLANE, 128), lambda c, i: (c, 0)),
        scratch_shapes=[
            pltpu.VMEM((st_ner["row_tile"], st_ner["lanes"]), jnp.float32),
            pltpu.VMEM((st_re["row_tile"], st_re["lanes"]), jnp.float32),
        ],
        compiler_params=pltpu.CompilerParams(
            dimension_semantics=("parallel", "arbitrary"),
            vmem_limit_bytes=40 * 1024 * 1024,
        ),
    )(np2, nl2, rp2, rl2)

    # One tiny partial per core split; sum in the wrapper.
    return jnp.sum(out[::_SUBLANE, 0])


def bce_loss(ner_pred, ner_label, re_pred, re_label, *,
             hard_labels=False, target_block_bytes=2 * 1024 * 1024):
    """Forward pass of the BCEloss module."""
    seq_len = ner_pred.shape[1]
    total = bce_pair_sum(ner_pred, ner_label, re_pred, re_label,
                         hard_labels=hard_labels,
                         target_block_bytes=target_block_bytes)
    return total / seq_len


def _bce_ref(pred, label):
    p = pred.astype(jnp.float32)
    y = label.astype(jnp.float32)
    return jnp.sum(-(y * jnp.maximum(jnp.log(p), -100.0)
                     + (1.0 - y) * jnp.maximum(jnp.log(1.0 - p), -100.0)))


if __name__ == "__main__":
    key = jax.random.PRNGKey(0)
    k1, k2, k3, k4 = jax.random.split(key, 4)

    B, S = 2, 8
    L_NER, L_RE = 16, 16

    # Predictions are probabilities in (0, 1), labels are {0, 1}.
    ner_pred = jax.random.uniform(k1, (B, S, L_NER), jnp.float32, 0.01, 0.99)
    ner_label = jax.random.bernoulli(k2, 0.3, (B, S, L_NER)).astype(jnp.float32)
    re_pred = jax.random.uniform(k3, (B, S, S, L_RE), jnp.float32, 0.01, 0.99)
    re_label = jax.random.bernoulli(k4, 0.1, (B, S, S, L_RE)).astype(jnp.float32)

    ref = (_bce_ref(ner_pred, ner_label) + _bce_ref(re_pred, re_label)) / S

    # Default (soft-label-exact) two-log path.
    loss = jax.block_until_ready(bce_loss(ner_pred, ner_label, re_pred, re_label))
    assert jnp.allclose(loss, ref, rtol=1e-5, atol=1e-4), (loss, ref)

    # Optional hard-label fast path (labels here are exactly {0,1}).
    loss_hard = jax.block_until_ready(
        bce_loss(ner_pred, ner_label, re_pred, re_label, hard_labels=True))
    assert jnp.allclose(loss_hard, ref, rtol=1e-5, atol=1e-4), (loss_hard, ref)

    # Odd sizes + tiny block budget: exercises multi-tile grid, the gated partial-tail
    # mask, index clamping for the exhausted stream, and the 2-way core split.
    B2, S2 = 3, 11
    ner_pred2 = jax.random.uniform(k1, (B2, S2, 13), jnp.float32, 0.01, 0.99)
    ner_label2 = jax.random.bernoulli(k2, 0.3, (B2, S2, 13)).astype(jnp.float32)
    re_pred2 = jax.random.uniform(k3, (B2, S2, S2, 13), jnp.float32, 0.01, 0.99)
    re_label2 = jax.random.bernoulli(k4, 0.1, (B2, S2, S2, 13)).astype(jnp.float32)
    ref2 = (_bce_ref(ner_pred2, ner_label2) + _bce_ref(re_pred2, re_label2)) / S2
    loss2 = jax.block_until_ready(
        bce_loss(ner_pred2, ner_label2, re_pred2, re_label2, target_block_bytes=4096))
    assert jnp.allclose(loss2, ref2, rtol=1e-5, atol=1e-4), (loss2, ref2)

    print("KERNEL_OK")
</pallas_src>

<mosaic_0001>
module attributes {stable_mosaic.version = 11 : i64} {
  func.func @kernel(%arg0: i32, %arg1: i32, %arg2: memref<1x256xf32, #tpu.memory_space<vmem>>, %arg3: memref<1x256xf32, #tpu.memory_space<vmem>>, %arg4: memref<2x1024xf32, #tpu.memory_space<vmem>>, %arg5: memref<2x1024xf32, #tpu.memory_space<vmem>>, %arg6: memref<8x128xf32, #tpu.memory_space<vmem>>, %arg7: memref<1x256xf32, #tpu.memory_space<vmem>>, %arg8: memref<2x1024xf32, #tpu.memory_space<vmem>>) attributes {dimension_semantics = [#tpu.dimension_semantics<parallel>, #tpu.dimension_semantics<arbitrary>], iteration_bounds = array<i64: 2, 1>, scalar_prefetch = 0 : i64, scratch_operands = 2 : i64, tpu.core_type = #tpu.core_type<tc>, window_params = [{transform_indices = @transform_0, window_bounds = array<i64: 1, 256>}, {transform_indices = @transform_1, window_bounds = array<i64: 1, 256>}, {transform_indices = @transform_2, window_bounds = array<i64: 2, 1024>}, {transform_indices = @transform_3, window_bounds = array<i64: 2, 1024>}, {transform_indices = @transform_4, window_bounds = array<i64: 8, 128>}]} {
    %c1_i32 = arith.constant 1 : i32
    %0 = arith.muli %arg0, %c1_i32 : i32
    %1 = arith.addi %0, %arg1 : i32
    %c0_i32 = arith.constant 0 : i32
    %2 = arith.cmpi eq, %arg1, %c0_i32 : i32
    %3 = arith.extui %2 : i1 to i32
    %c0_i32_0 = arith.constant 0 : i32
    %4 = arith.cmpi ne, %3, %c0_i32_0 : i32
    scf.if %4 {
      %cst = arith.constant 0.000000e+00 : f32
      %14 = vector.broadcast %cst : f32 to vector<1x256xf32>
      %c0 = arith.constant 0 : index
      %c0_7 = arith.constant 0 : index
      %15 = vector.load %arg7[%c0, %c0_7] : memref<1x256xf32, #tpu.memory_space<vmem>>, vector<1x256xf32>
      tpu.vector_store %arg7[%c0, %c0_7], %14 {strides = array<i32>} : memref<1x256xf32, #tpu.memory_space<vmem>>, vector<1x256xf32>,
      %cst_8 = arith.constant 0.000000e+00 : f32
      %16 = vector.broadcast %cst_8 : f32 to vector<2x1024xf32>
      %c0_9 = arith.constant 0 : index
      %c0_10 = arith.constant 0 : index
      %17 = vector.load %arg8[%c0_9, %c0_10] : memref<2x1024xf32, #tpu.memory_space<vmem>>, vector<2x1024xf32>
      tpu.vector_store %arg8[%c0_9, %c0_10], %16 {strides = array<i32>} : memref<2x1024xf32, #tpu.memory_space<vmem>>, vector<2x1024xf32>,
    } else {
    }
    %c1_i32_1 = arith.constant 1 : i32
    %5 = arith.cmpi slt, %1, %c1_i32_1 : i32
    %6 = arith.extui %5 : i1 to i32
    %c0_i32_2 = arith.constant 0 : i32
    %7 = arith.cmpi ne, %6, %c0_i32_2 : i32
    scf.if %7 {
      %c0 = arith.constant 0 : index
      %c0_7 = arith.constant 0 : index
      %14 = vector.load %arg2[%c0, %c0_7] : memref<1x256xf32, #tpu.memory_space<vmem>>, vector<1x256xf32>
      %c0_8 = arith.constant 0 : index
      %c0_9 = arith.constant 0 : index
      %15 = vector.load %arg3[%c0_8, %c0_9] : memref<1x256xf32, #tpu.memory_space<vmem>>, vector<1x256xf32>
      %c0_10 = arith.constant 0 : index
      %c0_11 = arith.constant 0 : index
      %16 = vector.load %arg7[%c0_10, %c0_11] : memref<1x256xf32, #tpu.memory_space<vmem>>, vector<1x256xf32>
      %17 = math.log %14 : vector<1x256xf32>
      %cst = arith.constant -1.000000e+02 : f32
      %18 = vector.broadcast %cst : f32 to vector<1x256xf32>
      %19 = arith.maximumf %17, %18 : vector<1x256xf32>
      %cst_12 = arith.constant 1.000000e+00 : f32
      %20 = vector.broadcast %cst_12 : f32 to vector<1x256xf32>
      %21 = arith.subf %20, %14 : vector<1x256xf32>
      %22 = math.log %21 : vector<1x256xf32>
      %cst_13 = arith.constant -1.000000e+02 : f32
      %23 = vector.broadcast %cst_13 : f32 to vector<1x256xf32>
      %24 = arith.maximumf %22, %23 : vector<1x256xf32>
      %25 = arith.subf %19, %24 : vector<1x256xf32>
      %26 = arith.mulf %15, %25 : vector<1x256xf32>
      %27 = arith.addf %24, %26 : vector<1x256xf32>
      %28 = arith.subf %16, %27 : vector<1x256xf32>
      %c0_14 = arith.constant 0 : index
      %c0_15 = arith.constant 0 : index
      %29 = vector.load %arg7[%c0_14, %c0_15] : memref<1x256xf32, #tpu.memory_space<vmem>>, vector<1x256xf32>
      tpu.vector_store %arg7[%c0_14, %c0_15], %28 {strides = array<i32>} : memref<1x256xf32, #tpu.memory_space<vmem>>, vector<1x256xf32>,
    } else {
    }
    %c1_i32_3 = arith.constant 1 : i32
    %8 = arith.cmpi slt, %1, %c1_i32_3 : i32
    %9 = arith.extui %8 : i1 to i32
    %c0_i32_4 = arith.constant 0 : i32
    %10 = arith.cmpi ne, %9, %c0_i32_4 : i32
    scf.if %10 {
      %c0 = arith.constant 0 : index
      %c0_7 = arith.constant 0 : index
      %14 = vector.load %arg4[%c0, %c0_7] : memref<2x1024xf32, #tpu.memory_space<vmem>>, vector<2x1024xf32>
      %c0_8 = arith.constant 0 : index
      %c0_9 = arith.constant 0 : index
      %15 = vector.load %arg5[%c0_8, %c0_9] : memref<2x1024xf32, #tpu.memory_space<vmem>>, vector<2x1024xf32>
      %c0_10 = arith.constant 0 : index
      %c0_11 = arith.constant 0 : index
      %16 = vector.load %arg8[%c0_10, %c0_11] : memref<2x1024xf32, #tpu.memory_space<vmem>>, vector<2x1024xf32>
      %17 = math.log %14 : vector<2x1024xf32>
      %cst = arith.constant -1.000000e+02 : f32
      %18 = vector.broadcast %cst : f32 to vector<2x1024xf32>
      %19 = arith.maximumf %17, %18 : vector<2x1024xf32>
      %cst_12 = arith.constant 1.000000e+00 : f32
      %20 = vector.broadcast %cst_12 : f32 to vector<2x1024xf32>
      %21 = arith.subf %20, %14 : vector<2x1024xf32>
      %22 = math.log %21 : vector<2x1024xf32>
      %cst_13 = arith.constant -1.000000e+02 : f32
      %23 = vector.broadcast %cst_13 : f32 to vector<2x1024xf32>
      %24 = arith.maximumf %22, %23 : vector<2x1024xf32>
      %25 = arith.subf %19, %24 : vector<2x1024xf32>
      %26 = arith.mulf %15, %25 : vector<2x1024xf32>
      %27 = arith.addf %24, %26 : vector<2x1024xf32>
      %28 = arith.subf %16, %27 : vector<2x1024xf32>
      %c0_14 = arith.constant 0 : index
      %c0_15 = arith.constant 0 : index
      %29 = vector.load %arg8[%c0_14, %c0_15] : memref<2x1024xf32, #tpu.memory_space<vmem>>, vector<2x1024xf32>
      tpu.vector_store %arg8[%c0_14, %c0_15], %28 {strides = array<i32>} : memref<2x1024xf32, #tpu.memory_space<vmem>>, vector<2x1024xf32>,
    } else {
    }
    %c0_i32_5 = arith.constant 0 : i32
    %11 = arith.cmpi eq, %arg1, %c0_i32_5 : i32
    %12 = arith.extui %11 : i1 to i32
    %c0_i32_6 = arith.constant 0 : i32
    %13 = arith.cmpi ne, %12, %c0_i32_6 : i32
    scf.if %13 {
      %c0 = arith.constant 0 : index
      %c0_7 = arith.constant 0 : index
      %14 = vector.load %arg7[%c0, %c0_7] : memref<1x256xf32, #tpu.memory_space<vmem>>, vector<1x256xf32>
      %15 = vector.shape_cast %14 : vector<1x256xf32> to vector<1x1x256xf32>
      %cst = arith.constant dense<0.000000e+00> : vector<1xf32>
      %16 = vector.multi_reduction <add>, %15, %cst [1, 2] : vector<1x1x256xf32> to vector<1xf32>
      %17 = vector.shape_cast %16 : vector<1xf32> to vector<1x1x1xf32>
      %18 = vector.extract %17[0, 0, 0] : f32 from vector<1x1x1xf32>
      %c0_8 = arith.constant 0 : index
      %c0_9 = arith.constant 0 : index
      %19 = vector.load %arg8[%c0_8, %c0_9] : memref<2x1024xf32, #tpu.memory_space<vmem>>, vector<2x1024xf32>
      %20 = vector.shape_cast %19 : vector<2x1024xf32> to vector<1x2x1024xf32>
      %cst_10 = arith.constant dense<0.000000e+00> : vector<1xf32>
      %21 = vector.multi_reduction <add>, %20, %cst_10 [1, 2] : vector<1x2x1024xf32> to vector<1xf32>
      %22 = vector.shape_cast %21 : vector<1xf32> to vector<1x1x1xf32>
      %23 = vector.extract %22[0, 0, 0] : f32 from vector<1x1x1xf32>
      %24 = arith.addf %18, %23 : f32
      %25 = vector.broadcast %24 : f32 to vector<8x128xf32>
      %c0_11 = arith.constant 0 : index
      %c0_12 = arith.constant 0 : index
      %26 = vector.load %arg6[%c0_11, %c0_12] : memref<8x128xf32, #tpu.memory_space<vmem>>, vector<8x128xf32>
      tpu.vector_store %arg6[%c0_11, %c0_12], %25 {strides = array<i32>} : memref<8x128xf32, #tpu.memory_space<vmem>>, vector<8x128xf32>,
    } else {
    }
    return
  }
  func.func @transform_0(%arg0: i32, %arg1: i32) -> (i32, i32) {
    %c1_i32 = arith.constant 1 : i32
    %0 = arith.muli %arg0, %c1_i32 : i32
    %1 = arith.addi %0, %arg1 : i32
    %c0_i32 = arith.constant 0 : i32
    %2 = arith.minsi %1, %c0_i32 : i32
    %c0_i32_0 = arith.constant 0 : i32
    %c0_i32_1 = arith.constant 0 : i32
    return %2, %c0_i32_0 : i32, i32
  }
  func.func @transform_1(%arg0: i32, %arg1: i32) -> (i32, i32) {
    %c1_i32 = arith.constant 1 : i32
    %0 = arith.muli %arg0, %c1_i32 : i32
    %1 = arith.addi %0, %arg1 : i32
    %c0_i32 = arith.constant 0 : i32
    %2 = arith.minsi %1, %c0_i32 : i32
    %c0_i32_0 = arith.constant 0 : i32
    %c0_i32_1 = arith.constant 0 : i32
    return %2, %c0_i32_0 : i32, i32
  }
  func.func @transform_2(%arg0: i32, %arg1: i32) -> (i32, i32) {
    %c1_i32 = arith.constant 1 : i32
    %0 = arith.muli %arg0, %c1_i32 : i32
    %1 = arith.addi %0, %arg1 : i32
    %c0_i32 = arith.constant 0 : i32
    %2 = arith.minsi %1, %c0_i32 : i32
    %c0_i32_0 = arith.constant 0 : i32
    %c0_i32_1 = arith.constant 0 : i32
    return %2, %c0_i32_0 : i32, i32
  }
  func.func @transform_3(%arg0: i32, %arg1: i32) -> (i32, i32) {
    %c1_i32 = arith.constant 1 : i32
    %0 = arith.muli %arg0, %c1_i32 : i32
    %1 = arith.addi %0, %arg1 : i32
    %c0_i32 = arith.constant 0 : i32
    %2 = arith.minsi %1, %c0_i32 : i32
    %c0_i32_0 = arith.constant 0 : i32
    %c0_i32_1 = arith.constant 0 : i32
    return %2, %c0_i32_0 : i32, i32
  }
  func.func @transform_4(%arg0: i32, %arg1: i32) -> (i32, i32) {
    %c0_i32 = arith.constant 0 : i32
    %c0_i32_0 = arith.constant 0 : i32
    return %arg0, %c0_i32 : i32, i32
  }
}

</mosaic_0001>

<bundles_post_ra>
// kernel: tpu_custom_call.1
= control target key start
LH: loop header
LB: loop body
LE: loop exit
PB: predicated region body
PF: predicated region fallthrough
CT: control target
= control target key end

     0   :  { %s1334_s0 = inlined_call_operand.hbm [shape: f32[1,256], index: 0, kind: input, shape index: {}]   ;;  %s1335_s1 = inlined_call_operand.hbm [shape: f32[1,256], index: 1, kind: input, shape index: {}]   ;;  %s1336_s2 = inlined_call_operand.hbm [shape: f32[2,1024], index: 2, kind: input, shape index: {}]   ;;  %s1337_s3 = inlined_call_operand.hbm [shape: f32[2,1024], index: 3, kind: input, shape index: {}]   ;;  %s1338_s4 = inlined_call_operand.hbm [shape: f32[16,128], index: 4, kind: output, shape index: {}]  }
   0x1   :  { %1341 = sst [smem:[#allocation19_spill]] %s1335_s1 }
   0x2   :  { %9 = vsyncpa [#allocation5], 0 }
   0x3   :  { %11 = vsyncpa [#allocation5 + $0x1], 0 }
   0x4   :  { %12 = vsyncpa [#allocation8], 0 }
   0x5   :  { %14 = vsyncpa [#allocation8 + $0x1], 0 }
   0x6   :  { %15 = vsyncpa [#allocation11], 0 }
   0x7   :  { %17 = vsyncpa [#allocation11 + $0x1], 0 }
   0x8   :  { %18 = vsyncpa [#allocation6], 0 }
   0x9   :  { %20 = vsyncpa [#allocation6 + $0x1], 0  ;;  %s1097_s15 = smov 0   ;;  %s1099_s16 = smov 0  }
   0xa   :  { %s1101_s17 = smov 0   ;;  %s1103_s18 = smov 0  }
   0xb   :  { %s1105_s19 = smov 0   ;;  %s1107_s20 = smov 0  }
   0xc   :  { %s1109_s21 = smov 0   ;;  %s1111_s22 = smov 0  }
   0xd LB: > { %1342 = sst [smem:[#allocation17_spill]] %s1061_s21  ;;  %s1136_s23 = sadd.s32 4294967295, %s1065_s22   ;;  %s1065_s22 = sphi %s1111_s22, %s26_s22   ;;  %s1061_s21 = sphi %s1109_s21, %s1354_s21   ;;  %s1057_s20 = sphi %s1107_s20, %s1353_s20   ;;  %s1053_s19 = sphi %s1105_s19, %s1324_s19   ;;  %s1049_s18 = sphi %s1103_s18, %s1358_s18   ;;  %s1045_s17 = sphi %s1101_s17, %s1357_s17   ;;  %s1041_s16 = sphi %s1099_s16, %s1356_s16   ;;  %s1037_s15 = sphi %s1097_s15, %s1355_s15  }
   0xe   : > { %s690_s24 = sadd.s32 4294967294, %s1065_s22   ;;  %s38_s25 = sadd.s32 1, %s1061_s21 }
   0xf   : > { %p40_p0 = scmp.ge.s32.totalorder %s38_s25, 2  ;;  %p1034_p1 = scmp.ne.s32.totalorder %s1053_s19, 0 }
  0x10   : > { %p59_p2 = scmp.eq.s32.totalorder %s1065_s22, 0  ;;  %p64_p3 = scmp.ne.s32.totalorder %s1053_s19, %s1049_s18 }
  0x11   : > { %s1360_s25 = smov (%p40_p0, %s38_s25), 0  ;;  %p65_p5 = scmp.eq.s32.totalorder %s1136_s23, 0 }
  0x12   : > { %1343 = sst [smem:[#allocation18_spill]] %s1360_s25  ;;  %p1145_p4 = por %p1034_p1, %p59_p2 }
  0x13   : > { %p1150_p6 = por %p65_p5, %p64_p3  ;;  %s170_s28 = ssub.s32 %s1061_s21, %s1360_s25 }
  0x14   : > { %p171_p7 = scmp.eq.s32.totalorder %s170_s28, 0  ;;  %s173_s29 = sadd.s32 1, %s1045_s17 }
  0x15   : > { %p183_p8 = scmp.ne.s32.totalorder %s1045_s17, %s1041_s16  ;;  %p184_p9 = scmp.eq.s32.totalorder %s1136_s23, 1 }
  0x16   : > { %s1158_s30 = scalar_select %p171_p7, %s1045_s17, %s173_s29  }
  0x17   : > { %p189_p10 = scmp.ne.s32.totalorder %s1041_s16, %s1037_s15  ;;  %p190_p11 = scmp.eq.s32.totalorder %s690_s24, 1 }
  0x18   : > { %p1165_p12 = por %p184_p9, %p183_p8  ;;  %p692_p13 = scmp.ge.s32.totalorder %s1065_s22, 2 }
  0x19   : > { %p1170_p0 = por %p190_p11, %p189_p10  ;;  %p747_p1 = scmp.lt.s32.totalorder %s1065_s22, 2 }
  0x1a   : > { %s232_s8 = sand.u32 1, %s1065_s22   ;;  %s1067_s9 = smov [#allocation7]  }
  0x1b   : > { %p1177_p2 = pnand %p747_p1, %p1145_p4  ;;  %s247_s10 = sshll.u32 %s1067_s9, 4  ;;  %s248_s10 = int_to_ptr.vmem [resolvable:$true] %s247_s10 }
  0x1c   : > { %s1349_s1 = sld [smem:[#allocation19_spill]]  ;;  %p703_p3 = scmp.ge.s32.totalorder %s1065_s22, 1 }
  0x1d   : > { %s1186_s14 = scalar_lea.sflag [#allocation8], %s232_s8  ;;  %p838_p5 = pneg %p1177_p2 }
  0x22   : > { %s245_s13 = sshll.u32 %s1349_s1, 4  ;;  %s841_s29 = scalar_lea.hbm %s1349_s1, 2  ;;  %s246_s13 = int_to_ptr.hbm [resolvable:$true] %s245_s13 }
  0x23   : > { %s834_s18 = sshra.s32 %s246_s13, 4  ;;  %s835_s18 = int_to_ptr.hbm [resolvable:$true] %s834_s18 }
  0x24   : > { %s836_s24 = scalar_lea.hbm %s835_s18, 2 }
  0x25   : > { %p837_p4 = scmp.ne.s32.totalorder %s835_s18, %s836_s24  ;;  %p843_p9 = scmp.lt.s32.totalorder %s841_s29, %s836_s24 }
  0x27   : > { %p839_p7 = pnand %p838_p5, %p837_p4 }
  0x29   : > { %p840_p8 = pneg %p839_p7 }
  0x2b   : > { %p845_p10 = pnand %p843_p9, %p840_p8 }
  0x2d   : > { %848 = shalt.err (!%p845_p10)
}
  0x2e   : > { %736 = dma.hbm_to_vmem [thread:$0]  (!%p1177_p2), %s246_s13, 32, %s248_s10, %s1186_s14  }
  0x2f   : > { %p298_p11 = scmp.lt.s32.totalorder %s1065_s22, 3  ;;  %s1068_s9 = smov [#allocation4]  }
  0x30   : > { %s225_s11 = sshll.u32 %s1068_s9, 4  ;;  %s223_s24 = sshll.u32 %s1334_s0, 4  ;;  %s226_s11 = int_to_ptr.vmem [resolvable:$true] %s225_s11  ;;  %s224_s24 = int_to_ptr.hbm [resolvable:$true] %s223_s24 }
  0x31   : > { %p1202_p1 = pnand %p703_p3, %p298_p11  ;;  %s864_s26 = sshra.s32 %s224_s24, 4  ;;  %s865_s26 = int_to_ptr.hbm [resolvable:$true] %s864_s26 }
  0x32   : > { %s866_s28 = scalar_lea.hbm %s865_s26, 2  ;;  %s871_s29 = scalar_lea.hbm %s1334_s0, 2 }
  0x33   : > { %p867_p4 = scmp.ne.s32.totalorder %s865_s26, %s866_s28  ;;  %p873_p3 = scmp.lt.s32.totalorder %s871_s29, %s866_s28 }
  0x35   : > { %p869_p7 = pnand %p867_p4, %p838_p5 }
  0x37   : > { %p870_p8 = pneg %p869_p7 }
  0x39   : > { %p875_p9 = pnand %p873_p3, %p870_p8 }
  0x3b   : > { %878 = shalt.err (!%p875_p9)
}
  0x3c   : > { %733 = dma.hbm_to_vmem [thread:$0]  (!%p1177_p2), %s224_s24, 32, %s226_s11, [#allocation5]  }
  0x3d   : > { %s1069_s9 = smov [#allocation9]   ;;  %s268_s26 = sshll.u32 %s1336_s2, 4  ;;  %s269_s26 = int_to_ptr.hbm [resolvable:$true] %s268_s26 }
  0x3e   : > { %s270_s12 = sshll.u32 %s1069_s9, 4  ;;  %s894_s25 = sshra.s32 %s269_s26, 4  ;;  %s271_s12 = int_to_ptr.vmem [resolvable:$true] %s270_s12  ;;  %s895_s25 = int_to_ptr.hbm [resolvable:$true] %s894_s25 }
  0x3f   : > { %s896_s21 = scalar_lea.hbm %s895_s25, 16  ;;  %s901_s11 = scalar_lea.hbm %s1336_s2, 16 }
  0x40   : > { %p897_p10 = scmp.ne.s32.totalorder %s895_s25, %s896_s21  ;;  %p903_p7 = scmp.lt.s32.totalorder %s901_s11, %s896_s21 }
  0x42   : > { %p899_p11 = pnand %p897_p10, %p838_p5 }
  0x44   : > { %p900_p4 = pneg %p899_p11 }
  0x46   : > { %p905_p8 = pnand %p903_p7, %p900_p4 }
  0x48   : > { %908 = shalt.err (!%p905_p8)
}
  0x49   : > { %739 = dma.hbm_to_vmem [thread:$0]  (!%p1177_p2), %s269_s26, 256, %s271_s12, %s1186_s14  }
  0x4a   : > { %s291_s25 = sshll.u32 %s1337_s3, 4  ;;  %s1070_s13 = smov [#allocation10]   ;;  %s292_s25 = int_to_ptr.hbm [resolvable:$true] %s291_s25 }
  0x4b   : > { %s293_s29 = sshll.u32 %s1070_s13, 4  ;;  %s924_s9 = sshra.s32 %s292_s25, 4  ;;  %s294_s29 = int_to_ptr.vmem [resolvable:$true] %s293_s29  ;;  %s925_s9 = int_to_ptr.hbm [resolvable:$true] %s924_s9 }
  0x4c   : > { %s926_s18 = scalar_lea.hbm %s925_s9, 16  ;;  %s931_s14 = scalar_lea.hbm %s1337_s3, 16 }
  0x4d   : > { %p927_p3 = scmp.ne.s32.totalorder %s925_s9, %s926_s18  ;;  %p933_p11 = scmp.lt.s32.totalorder %s931_s14, %s926_s18 }
  0x4f   : > { %p929_p9 = pnand %p927_p3, %p838_p5 }
  0x51   : > { %p930_p10 = pneg %p929_p9 }
  0x53   : > { %p935_p4 = pnand %p933_p11, %p930_p10 }
  0x55   : > { %938 = shalt.err (!%p935_p4)
}
  0x56   : > { %742 = dma.hbm_to_vmem [thread:$0]  (!%p1177_p2), %s292_s25, 256, %s294_s29, [#allocation11]  }
  0x57   : > { %302 = sbr.rel (%p1202_p1) target bundleno = 345 (0x159), region = 36  ;;  %s304_s12 = sand.u32 (!%p1202_p1), 1, %s1053_s19  }
  0x58   : > { %s704_s26 = sshll.u32 (!%p1202_p1), %s304_s12, 1  ;;  %s305_s10 = scalar_lea.sflag (!%p1202_p1), [#allocation5], %s304_s12 }
  0x59   : > { %s308_s11 = scalar_lea.vmem (!%p1202_p1), [#allocation4], %s704_s26 }
  0x5c   : > { %1019 = dma.done.wait (%p1150_p6), %s305_s10, 32  }
  0x5d   : > { %1021 = vsyncadd (%p1150_p6), %s305_s10, 4294967264  ;;  %s314_s1 = sand.u32 1, %s1136_s23   ;;  %s1248_s7 = scalar_lea.vmem [#allocation7], %s704_s26 }
  0x5e   : > { %s315_s24 = scalar_lea.sflag [#allocation8], %s314_s1 }
  0x5f   : > { %1023 = dma.done.wait (%p1150_p6), %s315_s24, 288  }
  0x60   : > { %1025 = vsyncadd (%p1150_p6), %s315_s24, 4294967008  ;;  %s706_s8 = sshll.u32 %s304_s12, 4  ;;  %s335_s13 = scalar_lea.sflag [#allocation11], %s304_s12 }
  0x61   : > { %s328_s25 = scalar_lea.vmem [#allocation9], %s706_s8  ;;  %s1254_s29 = scalar_lea.vmem [#allocation10], %s706_s8 }
  0x62   : > { %1027 = dma.done.wait (%p1150_p6), %s335_s13, 256  }
  0x63   : > { %1029 = vsyncadd (%p1150_p6), %s335_s13, 4294967040  ;;  %s376_s23 = sand.u32 1, %s1041_s16   ;;  %v396_v0 = vlaneseq  ;;  %v1071_v1 = vmov 0.0   ;;  %p709_p6 = scmp.ge.s32.totalorder %s1057_s20, 1 }
  0x64   : > { %s1263_s9 = sshll.u32 %s376_s23, 3  ;;  %401 = vst [vmem:[#allocation3] sm:$0xff] %v1071_v1 }
  0x65   : > { %vm1265_vm0 = vcmp.lt.s32.totalorder %v396_v0, 256  ;;  %402 = vst [vmem:[#allocation3 + $0x8] sm:$0xff] %v1071_v1  ;;  %s378_s27 = scalar_lea.vmem [#allocation12], %s1263_s9  ;;  %406 = sbr.rel (%p709_p6) target bundleno = 132 (0x84), region = 60 }
  0x66   : > { %400 = vst.msk [vmem:[#allocation2] sm:$0x3] %vm1265_vm0, %v1071_v1 }
  0x6a   : > { %v407_v3 = vld [vmem:[%s308_s11] sm:$0x3]  ;;  %v426_v5 = vld [vmem:[%s328_s25] sm:$0xff]  ;;  %v408_v23 = vld [vmem:[%s1248_s7] sm:$0x3] }
  0x6b   : > { %822 = vlog2.f32 %v407_v3  ;;  %v413_v4 = vsub.f32 1.0, %v407_v3  ;;  %v438_v6 = vsub.f32 1.0, %v426_v5  ;;  %v427_v7 = vld [vmem:[%s328_s25 + $0x8] sm:$0xff]  ;;  %v428_v27 = vld [vmem:[%s1254_s29] sm:$0xff] }
  0x6c   : > { %824 = vlog2.f32 %v426_v5  ;;  %v439_v8 = vsub.f32 1.0, %v427_v7  ;;  %v429_v32 = vld [vmem:[%s1254_s29 + $0x8] sm:$0xff]  ;;  %v431_v41 = vld [vmem:[#allocation3 + $0x8] sm:$0xff] }
  0x6d   : > { %826 = vlog2.f32 %v413_v4  ;;  %v409_v33 = vld [vmem:[#allocation2] sm:$0x3]  ;;  %v430_v37 = vld [vmem:[#allocation3] sm:$0xff] }
  0x6e   : > { %828 = vlog2.f32 %v438_v6 }
  0x6f   : > { %830 = vlog2.f32 %v427_v7 }
  0x70   : > { %832 = vlog2.f32 %v439_v8 }
  0x71   : > { %v823_v9 = vpop.eup %822 }
  0x72   : > { %v825_v10 = vpop.eup %824  ;;  %v411_v11 = vmul.f32 0.6931472, %v823_v9 }
  0x73   : > { %v827_v12 = vpop.eup %826  ;;  %v433_v13 = vmul.f32 0.6931472, %v825_v10 }
  0x74   : > { %v829_v14 = vpop.eup %828  ;;  %v412_v15 = vmax.f32 %v411_v11, -100.0  ;;  %v415_v16 = vmul.f32 0.6931472, %v827_v12 }
  0x75   : > { %v831_v17 = vpop.eup %830  ;;  %v436_v18 = vmax.f32 %v433_v13, -100.0  ;;  %v441_v19 = vmul.f32 0.6931472, %v829_v14 }
  0x76   : > { %v833_v20 = vpop.eup %832  ;;  %v416_v21 = vmax.f32 %v415_v16, -100.0  ;;  %v435_v22 = vmul.f32 0.6931472, %v831_v17 }
  0x77   : > { %v444_v24 = vmax.f32 %v441_v19, -100.0  ;;  %v443_v25 = vmul.f32 0.6931472, %v833_v20 }
  0x78   : > { %v417_v26 = vsub.f32 %v412_v15, %v416_v21  ;;  %v437_v28 = vmax.f32 %v435_v22, -100.0 }
  0x79   : > { %v446_v29 = vsub.f32 %v436_v18, %v444_v24  ;;  %v445_v30 = vmax.f32 %v443_v25, -100.0 }
  0x7a   : > { %v418_v31 = vmul.f32 %v417_v26, %v408_v23 }
  0x7b   : > { %v448_v34 = vmul.f32 %v446_v29, %v428_v27  ;;  %v447_v35 = vsub.f32 %v437_v28, %v445_v30 }
  0x7c   : > { %v419_v36 = vadd.f32 %v418_v31, %v416_v21 }
  0x7d   : > { %v450_v38 = vadd.f32 %v448_v34, %v444_v24  ;;  %v449_v39 = vmul.f32 %v447_v35, %v429_v32 }
  0x7e   : > { %v420_v40 = vsub.f32 %v409_v33, %v419_v36 }
  0x7f   : > { %v452_v42 = vsub.f32 %v430_v37, %v450_v38  ;;  %v451_v43 = vadd.f32 %v449_v39, %v445_v30 }
  0x80   : > { %425 = vst.msk [vmem:[#allocation2] sm:$0x3] %vm1265_vm0, %v420_v40 }
  0x81   : > { %454 = vst [vmem:[#allocation3] sm:$0xff] %v452_v42  ;;  %v453_v44 = vsub.f32 %v431_v41, %v451_v43 }
  0x83   : > { %455 = vst [vmem:[#allocation3 + $0x8] sm:$0xff] %v453_v44 }
  0x84 PF: > { %vm465_vm1 = vcmask 1040384   ;;  %vm501_vm2 = vcmask 1041408   ;;  %s711_s18 = sshll.u32 %s1057_s20, 3  ;;  %s542_s12 = sshll.u32 %s378_s27, 4  ;;  %s543_s12 = int_to_ptr.vmem [resolvable:$true] %s542_s12 }
  0x85   : > { %s540_s14 = scalar_lea.hbm %s1338_s4, %s711_s18  ;;  %s530_s24 = scalar_lea.sflag [#allocation6], %s376_s23 }
  0x86   : > { %s544_s10 = sshll.u32 %s540_s14, 4  ;;  %s974_s13 = scalar_lea.hbm %s1338_s4, 16  ;;  %s545_s10 = int_to_ptr.hbm [resolvable:$true] %s544_s10 }
  0x87   : > { %v459_v45 = vld [vmem:[#allocation2] sm:$0x3]  ;;  %s968_s7 = sshra.s32 %s545_s10, 4  ;;  %s969_s7 = int_to_ptr.hbm [resolvable:$true] %s968_s7 }
  0x88   : > { %v478_v46 = vld [vmem:[#allocation3] sm:$0xff]  ;;  %v461_v48 = vperm.slane %v459_v45, 0  ;;  %v462_v49 = vperm.slane %v459_v45, 1  ;;  %s970_s20 = scalar_lea.hbm %s969_s7, 8  ;;  %p975_p7 = scmp.lt.s32.totalorder %s969_s7, %s1338_s4 }
  0x89   : > { %482 = vst [vmem:[#allocation1] ss:$4 sm:$0xff] %v478_v46  ;;  %p971_p2 = scmp.ne.s32.totalorder %s969_s7, %s970_s20  ;;  %p976_p8 = scmp.lt.s32.totalorder %s974_s13, %s970_s20 }
  0x8a   : > { %v479_v47 = vld [vmem:[#allocation3 + $0x8] sm:$0xff]  ;;  %v466_v50 = vsel %vm465_vm1, %v461_v48, 0.0  ;;  %v467_v51 = vsel %vm465_vm1, %v462_v49, 0.0 }
  0x8b   : > { %484 = vst [vmem:[#allocation1 + $0x20] ss:$4 sm:$0xff] %v479_v47  ;;  %v468_v52 = vadd.f32 %v467_v51, %v466_v50  ;;  %p972_p5 = pnand %p971_p2, %p1165_p12  ;;  %p977_p3 = por %p976_p8, %p975_p7 }
  0x8d   : > { %469 = vadd.xlane.f32.xlu0 %v468_v52  ;;  %p973_p1 = pneg %p972_p5 }
  0x8f   : > { %p978_p9 = pnand %p977_p3, %p973_p1 }
  0x90   : > { %v485_v53 = vld.sshfl [vmem:[#allocation1] sm:$0xff pattern:$0x73625140]  ;;  %v486_v54 = vld.sshfl [vmem:[#allocation1 + $0x8] sm:$0xff pattern:$0x73625140] }
  0x91   : > { %v487_v55 = vld.sshfl [vmem:[#allocation1 + $0x10] sm:$0xff pattern:$0x73625140]  ;;  %v488_v56 = vld.sshfl [vmem:[#allocation1 + $0x18] sm:$0xff pattern:$0x73625140] }
  0x92   : > { %v502_v57 = vsel %vm501_vm2, %v485_v53, 0.0  ;;  %v503_v58 = vsel %vm501_vm2, %v486_v54, 0.0  ;;  %v505_v59 = vsel %vm501_vm2, %v487_v55, 0.0  ;;  %v489_v60 = vld.sshfl [vmem:[#allocation1 + $0x20] sm:$0xff pattern:$0x73625140] }
  0x93   : > { %v504_v61 = vadd.f32 %v503_v58, %v502_v57  ;;  %v507_v62 = vsel %vm501_vm2, %v488_v56, 0.0  ;;  %v490_v63 = vld.sshfl [vmem:[#allocation1 + $0x28] sm:$0xff pattern:$0x73625140]  ;;  %v509_v1 = vsel %vm501_vm2, %v489_v60, 0.0 }
  0x94   : > { %v491_v2 = vld.sshfl [vmem:[#allocation1 + $0x30] sm:$0xff pattern:$0x73625140]  ;;  %v511_v4 = vsel %vm501_vm2, %v490_v63, 0.0 }
  0x95   : > { %v506_v0 = vadd.f32 %v505_v59, %v504_v61  ;;  %v492_v5 = vld.sshfl [vmem:[#allocation1 + $0x38] sm:$0xff pattern:$0x73625140]  ;;  %v513_v7 = vsel %vm501_vm2, %v491_v2, 0.0 }
  0x96   : > { %v515_v9 = vsel %vm501_vm2, %v492_v5, 0.0 }
  0x97   : > { %v508_v3 = vadd.f32 %v507_v62, %v506_v0 }
  0x99   : > { %v510_v6 = vadd.f32 %v509_v1, %v508_v3 }
  0x9b   : > { %v512_v8 = vadd.f32 %v511_v4, %v510_v6 }
  0x9d   : > { %v514_v10 = vadd.f32 %v513_v7, %v512_v8 }
  0x9f   : > { %v516_v11 = vadd.f32 %v515_v9, %v514_v10 }
  0xa1   : > { %517 = vadd.xlane.f32.xlu0 %v516_v11 }
 0x100   : > { %v470_v12 = vpop.xlane.xlu0 %469 }
 0x101   : > { %v471_v13 = vrot.slane %v470_v12, 4 }
 0x103   : > { %v472_v14 = vadd.f32 %v471_v13, %v470_v12 }
 0x105   : > { %v473_v15 = vrot.slane %v472_v14, 2 }
 0x107   : > { %v474_v16 = vadd.f32 %v473_v15, %v472_v14 }
 0x109   : > { %v475_v17 = vrot.slane %v474_v16, 1 }
 0x10b   : > { %v476_v18 = vadd.f32 %v475_v17, %v474_v16 }
 0x10d   : > { %716 = vpush %v476_v18 }
 0x114   : > { %v518_v19 = vpop.xlane.xlu0 %517 }
 0x115   : > { %v519_v20 = vrot.slane %v518_v19, 4 }
 0x117   : > { %v520_v21 = vadd.f32 %v519_v20, %v518_v19 }
 0x119   : > { %v521_v22 = vrot.slane %v520_v21, 2 }
 0x11b   : > { %v522_v23 = vadd.f32 %v521_v22, %v520_v21 }
 0x11d   : > { %v523_v24 = vrot.slane %v522_v23, 1 }
 0x11f   : > { %v524_v25 = vadd.f32 %v523_v24, %v522_v23 }
 0x121   : > { %718 = vpush %v524_v25 }
 0x13e   : > { %s717_s26 = spop %716 }
 0x152   : > { %s719_s11 = spop %718 }
 0x153   : > { %s526_s1 = sadd.f32 %s719_s11, %s717_s26 }
 0x155   : > { %v527_v26 = vstv %s526_s1 }
 0x156   : > { %528 = vst [vmem:[%s378_s27] sm:$0xff] %v527_v26 }
 0x157   : > { %981 = shalt.err (!%p978_p9)
}
 0x158   : > { %728 = dma.vmem_to_hbm [thread:$0]  (%p1165_p12), %s543_s12, 128, %s545_s10, %s530_s24  }
 0x159 PF: > { %s556_s23 = sand.u32 1, %s1037_s15   ;;  %p744_p10 = pnand %p692_p13, %p1170_p0 }
 0x15a   : > { %s557_s9 = scalar_lea.sflag [#allocation6], %s556_s23 }
 0x15b   : > { %p745_p11 = pneg %p744_p10 }
 0x15d   : > { %1031 = dma.done.wait (%p745_p11), %s557_s9, 128  }
 0x15e   : > { %1033 = vsyncadd (%p745_p11), %s557_s9, 4294967168  ;;  %s26_s22 = sadd.s32 1, %s1065_s22   ;;  %s1353_s20 = sld [smem:[#allocation17_spill]] }
 0x15f   : > { %p23_p4 = scmp.ge.s32.totalorder %s26_s22, 4   ;;  %s1354_s21 = sld [smem:[#allocation18_spill]] }
 0x160   : > { %s1355_s15 = smov %s1041_s16  ;;  %s1356_s16 = smov %s1045_s17 }
 0x161   : > { %s1357_s17 = smov %s1158_s30  ;;  %s1358_s18 = smov %s1053_s19 }
 0x162   : > { %s1324_s19 = smov 0   ;;  %25 = sbr.rel (!%p23_p4) target bundleno = 13 (0xd), region = 131 }
 0x167   :  { %563 = vsyncpa [#allocation5], 1 }
 0x168   :  { %565 = vsyncpa [#allocation5 + $0x1], 1 }
 0x169   :  { %566 = vsyncpa [#allocation8], 1 }
 0x16a   :  { %568 = vsyncpa [#allocation8 + $0x1], 1 }
 0x16b   :  { %569 = vsyncpa [#allocation11], 1 }
 0x16c   :  { %571 = vsyncpa [#allocation11 + $0x1], 1 }
 0x16d   :  { %572 = vsyncpa [#allocation6], 1 }
 0x16e   :  { %574 = vsyncpa [#allocation6 + $0x1], 1 }

</bundles_post_ra>
